<compile_context>
chip_gen: v7x
topology: tpu7x:2x2x1
jax: 0.10.0
libtpu: 0.0.40
codegen_flags: <defaults>
</compile_context>

<pallas_src>
import functools

import jax
import jax.numpy as jnp
from jax.experimental import pallas as pl
from jax.experimental.pallas import tpu as pltpu


def _round_up(x, m):
    return ((x + m - 1) // m) * m


def _fc_kernel(x_ref, w_ref, b_ref, o_ref, acc_ref, *, use_activation):
    # x_ref: (tm, tk)  w_ref: (tk, tn)  b_ref: (1, tn)  o_ref: (tm, tn)
    # acc_ref: (tm, tn) f32 scratch, resident across the K grid axis.
    k = pl.program_id(2)

    @pl.when(k == 0)
    def _init():
        acc_ref[...] = jnp.zeros_like(acc_ref)

    acc_ref[...] += jnp.dot(x_ref[...], w_ref[...],
                            preferred_element_type=jnp.float32)

    @pl.when(k == pl.num_programs(2) - 1)
    def _finalize():
        y = acc_ref[...] + b_ref[...]
        if use_activation:          # static Python flag -> specialized kernel
            y = jnp.maximum(y, 0.0)
        o_ref[...] = y.astype(o_ref.dtype)


def make_fc_layer(weight, bias, *, flatten_input=True, use_activation=True,
                  tm_cap=256, tn_cap=256, tk_cap=512):
    """Build the forward fn for one FC_Layer.

    weight: (N, K) PyTorch nn.Linear convention (out_features, in_features)
    bias:   (N,)
    Parameter prep (transpose + padding to lane/sublane-friendly shapes) is
    done once here, outside the per-call hot path.
    """
    N, K = weight.shape

    # Lane-dense output: pad N up to a multiple of 128 lanes.
    n_pad = _round_up(N, 128)
    tn = n_pad if n_pad <= tn_cap else tn_cap
    n_pad = _round_up(n_pad, tn)

    # Reduction (K) tiling: keep K whole when it comfortably fits VMEM,
    # otherwise pad to a multiple of tk and software-pipeline over it.
    if K <= 2048:
        tk, k_pad = K, K
    else:
        tk = tk_cap
        k_pad = _round_up(K, tk)

    # One-time parameter prep: (N, K) -> (K_pad, N_pad), bias -> (1, N_pad).
    w_p = jnp.pad(weight.T, ((0, k_pad - K), (0, n_pad - N)))
    b_p = jnp.pad(bias.astype(jnp.float32), (0, n_pad - N)).reshape(1, n_pad)

    kernel = functools.partial(_fc_kernel, use_activation=use_activation)

    def forward(x):
        if flatten_input:
            x = x.reshape(x.shape[0], -1)     # torch.flatten(x, start_dim=1)
        B, k_in = x.shape
        assert k_in == K, f"expected {K} input features, got {k_in}"

        # Pad batch (sublane dim) to a multiple of 8, tile at <= tm_cap rows.
        b_pad = _round_up(max(B, 1), 8)
        tm = b_pad if b_pad <= tm_cap else tm_cap
        b_pad = _round_up(b_pad, tm)

        if (b_pad, k_pad) != (B, K):
            x_p = jnp.pad(x, ((0, b_pad - B), (0, k_pad - K)))
        else:
            x_p = x

        grid = (b_pad // tm, n_pad // tn, k_pad // tk)

        out = pl.pallas_call(
            kernel,
            out_shape=jax.ShapeDtypeStruct((b_pad, n_pad), x.dtype),
            grid_spec=pltpu.PrefetchScalarGridSpec(
                num_scalar_prefetch=0,
                grid=grid,
                in_specs=[
                    pl.BlockSpec((tm, tk), lambda i, j, k: (i, k)),   # x
                    pl.BlockSpec((tk, tn), lambda i, j, k: (k, j)),   # w (K,N)
                    pl.BlockSpec((1, tn), lambda i, j, k: (0, j)),    # bias
                ],
                out_specs=pl.BlockSpec((tm, tn), lambda i, j, k: (i, j)),
                scratch_shapes=[pltpu.VMEM((tm, tn), jnp.float32)],
            ),
            compiler_params=pltpu.CompilerParams(
                dimension_semantics=("parallel", "parallel", "arbitrary")),
        )(x_p, w_p, b_p)

        return out[:B, :N]

    return forward


if __name__ == "__main__":
    key = jax.random.PRNGKey(0)
    k_x, k_w, k_b = jax.random.split(key, 3)

    # Previous layer: outputDimensions = 4 channels, not rolled out,
    # peptideSize = 33  ->  input_size = 4 * 33 = 132.  layer_size = 32.
    B, C, L = 2, 4, 33
    layer_size = 32
    input_size = C * L

    x = jax.random.normal(k_x, (B, C, L), dtype=jnp.float32)
    bound = 1.0 / float(input_size) ** 0.5
    weight = jax.random.uniform(k_w, (layer_size, input_size),
                                minval=-bound, maxval=bound, dtype=jnp.float32)
    bias = jax.random.uniform(k_b, (layer_size,),
                              minval=-bound, maxval=bound, dtype=jnp.float32)

    fc_relu = make_fc_layer(weight, bias, flatten_input=True,
                            use_activation=True)
    fc_linear = make_fc_layer(weight, bias, flatten_input=True,
                              use_activation=False)

    out_relu = jax.block_until_ready(fc_relu(x))
    out_linear = jax.block_until_ready(fc_linear(x))

    # Reference in plain JAX (same math as torch Linear [+ ReLU], eval dropout).
    x_flat = x.reshape(B, -1)
    ref_linear = x_flat @ weight.T + bias
    ref_relu = jnp.maximum(ref_linear, 0.0)

    assert out_relu.shape == (B, layer_size)
    assert out_linear.shape == (B, layer_size)
    assert jnp.allclose(out_relu, ref_relu, atol=1e-5, rtol=1e-5)
    assert jnp.allclose(out_linear, ref_linear, atol=1e-5, rtol=1e-5)

    print("KERNEL_OK")
</pallas_src>

<mosaic_0001>
module attributes {stable_mosaic.version = 11 : i64} {
  func.func @_fc_kernel(%arg0: i32, %arg1: i32, %arg2: i32, %arg3: memref<8x132xf32, #tpu.memory_space<vmem>>, %arg4: memref<132x128xf32, #tpu.memory_space<vmem>>, %arg5: memref<1x128xf32, #tpu.memory_space<vmem>>, %arg6: memref<8x128xf32, #tpu.memory_space<vmem>>, %arg7: memref<8x128xf32, #tpu.memory_space<vmem>>) attributes {dimension_semantics = [#tpu.dimension_semantics<parallel>, #tpu.dimension_semantics<parallel>, #tpu.dimension_semantics<arbitrary>], iteration_bounds = array<i64: 1, 1, 1>, scalar_prefetch = 0 : i64, scratch_operands = 1 : i64, tpu.core_type = #tpu.core_type<tc>, window_params = [{transform_indices = @transform_0, window_bounds = array<i64: 8, 132>}, {transform_indices = @transform_1, window_bounds = array<i64: 132, 128>}, {transform_indices = @transform_2, window_bounds = array<i64: 1, 128>}, {transform_indices = @transform_3, window_bounds = array<i64: 8, 128>}]} {
    %c0_i32 = arith.constant 0 : i32
    %0 = arith.cmpi eq, %arg2, %c0_i32 : i32
    %1 = arith.extui %0 : i1 to i32
    %c0_i32_0 = arith.constant 0 : i32
    %2 = arith.cmpi ne, %1, %c0_i32_0 : i32
    scf.if %2 {
      %cst_10 = arith.constant 0.000000e+00 : f32
      %12 = vector.broadcast %cst_10 : f32 to vector<8x128xf32>
      %c0_11 = arith.constant 0 : index
      %c0_12 = arith.constant 0 : index
      %13 = vector.load %arg7[%c0_11, %c0_12] : memref<8x128xf32, #tpu.memory_space<vmem>>, vector<8x128xf32>
      tpu.vector_store %arg7[%c0_11, %c0_12], %12 {strides = array<i32>} : memref<8x128xf32, #tpu.memory_space<vmem>>, vector<8x128xf32>,
    } else {
    }
    %c0 = arith.constant 0 : index
    %c0_1 = arith.constant 0 : index
    %3 = vector.load %arg7[%c0, %c0_1] : memref<8x128xf32, #tpu.memory_space<vmem>>, vector<8x128xf32>
    %c0_2 = arith.constant 0 : index
    %c0_3 = arith.constant 0 : index
    %4 = vector.load %arg3[%c0_2, %c0_3] : memref<8x132xf32, #tpu.memory_space<vmem>>, vector<8x132xf32>
    %c0_4 = arith.constant 0 : index
    %c0_5 = arith.constant 0 : index
    %5 = vector.load %arg4[%c0_4, %c0_5] : memref<132x128xf32, #tpu.memory_space<vmem>>, vector<132x128xf32>
    %cst = arith.constant dense<0.000000e+00> : vector<8x128xf32>
    %6 = tpu.matmul %4, %5, %cst {dimension_numbers = #tpu.dot_dimension_numbers<[1], [0], [0], [1], [0, 0, 1, 1], [], []>} : vector<8x132xf32>, vector<132x128xf32>, vector<8x128xf32> -> vector<8x128xf32>
    %7 = arith.addf %3, %6 : vector<8x128xf32>
    %c0_6 = arith.constant 0 : index
    %c0_7 = arith.constant 0 : index
    %8 = vector.load %arg7[%c0_6, %c0_7] : memref<8x128xf32, #tpu.memory_space<vmem>>, vector<8x128xf32>
    tpu.vector_store %arg7[%c0_6, %c0_7], %7 {strides = array<i32>} : memref<8x128xf32, #tpu.memory_space<vmem>>, vector<8x128xf32>,
    %c0_i32_8 = arith.constant 0 : i32
    %9 = arith.cmpi eq, %arg2, %c0_i32_8 : i32
    %10 = arith.extui %9 : i1 to i32
    %c0_i32_9 = arith.constant 0 : i32
    %11 = arith.cmpi ne, %10, %c0_i32_9 : i32
    scf.if %11 {
      %c0_10 = arith.constant 0 : index
      %c0_11 = arith.constant 0 : index
      %12 = vector.load %arg7[%c0_10, %c0_11] : memref<8x128xf32, #tpu.memory_space<vmem>>, vector<8x128xf32>
      %c0_12 = arith.constant 0 : index
      %c0_13 = arith.constant 0 : index
      %13 = vector.load %arg5[%c0_12, %c0_13] : memref<1x128xf32, #tpu.memory_space<vmem>>, vector<1x128xf32>
      %14 = vector.broadcast %13 : vector<1x128xf32> to vector<8x128xf32>
      %15 = arith.addf %12, %14 : vector<8x128xf32>
      %cst_14 = arith.constant 0.000000e+00 : f32
      %16 = vector.broadcast %cst_14 : f32 to vector<8x128xf32>
      %17 = arith.maximumf %15, %16 : vector<8x128xf32>
      %c0_15 = arith.constant 0 : index
      %c0_16 = arith.constant 0 : index
      %18 = vector.load %arg6[%c0_15, %c0_16] : memref<8x128xf32, #tpu.memory_space<vmem>>, vector<8x128xf32>
      tpu.vector_store %arg6[%c0_15, %c0_16], %17 {strides = array<i32>} : memref<8x128xf32, #tpu.memory_space<vmem>>, vector<8x128xf32>,
    } else {
    }
    return
  }
  func.func @transform_0(%arg0: i32, %arg1: i32, %arg2: i32) -> (i32, i32) {
    %c0_i32 = arith.constant 0 : i32
    return %arg0, %arg2 : i32, i32
  }
  func.func @transform_1(%arg0: i32, %arg1: i32, %arg2: i32) -> (i32, i32) {
    %c0_i32 = arith.constant 0 : i32
    return %arg2, %arg1 : i32, i32
  }
  func.func @transform_2(%arg0: i32, %arg1: i32, %arg2: i32) -> (i32, i32) {
    %c0_i32 = arith.constant 0 : i32
    %c0_i32_0 = arith.constant 0 : i32
    return %c0_i32, %arg1 : i32, i32
  }
  func.func @transform_3(%arg0: i32, %arg1: i32, %arg2: i32) -> (i32, i32) {
    %c0_i32 = arith.constant 0 : i32
    return %arg0, %arg1 : i32, i32
  }
}

</mosaic_0001>

<bundles_post_ra>
// kernel: tpu_custom_call.1
= control target key start
LH: loop header
LB: loop body
LE: loop exit
PB: predicated region body
PF: predicated region fallthrough
CT: control target
= control target key end

     0   :  { %8 = vsyncpa [#allocation4], 0  ;;  %s355_s0 = inlined_call_operand.hbm [shape: f32[8,132], index: 0, kind: input, shape index: {}]   ;;  %s356_s1 = inlined_call_operand.hbm [shape: f32[132,128], index: 1, kind: input, shape index: {}]   ;;  %s357_s2 = inlined_call_operand.vmem [shape: f32[1,128], index: 2, kind: input, shape index: {}]   ;;  %s358_s3 = inlined_call_operand.hbm [shape: f32[8,128], index: 3, kind: output, shape index: {}]  }
   0x1   :  { %9 = vsyncpa [#allocation7], 0 }
   0x2   :  { %10 = vsyncpa [#allocation5], 0  ;;  %s282_s12 = smov [#allocation3]   ;;  %s283_s14 = smov [#allocation6]  }
   0x3   :  { %s17_s13 = sshll.u32 %s282_s12, 4  ;;  %s26_s15 = sshll.u32 %s283_s14, 4  ;;  %s18_s13 = int_to_ptr.vmem [resolvable:$true] %s17_s13  ;;  %s309_s15 = int_to_ptr.vmem [resolvable:$true] %s26_s15 }
   0x4   :  { %s210_s18 = scalar_lea.hbm %s355_s0, 256 }
   0x5   :  { %p211_p0 = scmp.ne.s32.totalorder %s355_s0, %s210_s18  ;;  %p214_p1 = scmp.lt.u32.totalorder %s210_s18, %s355_s0 }
   0x7   :  { %p216_p2 = pnand %p214_p1, %p211_p0 }
   0x9   :  { %219 = shalt.err (!%p216_p2)
}
   0xa   :  { %s220_s23 = scalar_lea.vmem %s18_s13, 256  ;;  %p225_p4 = scmp.lt.s32.totalorder %s18_s13, %s18_s13 }
   0xb   :  { %p221_p3 = scmp.ne.s32.totalorder %s18_s13, %s220_s23  ;;  %p226_p5 = scmp.lt.s32.totalorder %s220_s23, %s220_s23 }
   0xd   :  { %p227_p6 = por %p226_p5, %p225_p4 }
   0xf   :  { %p228_p7 = pnand %p227_p6, %p221_p3 }
  0x11   :  { %231 = shalt.err (!%p228_p7)
}
  0x12   :  { %20 = dma.hbm_to_vmem [thread:$0]  %s355_s0, 256, %s18_s13, [#allocation4]  }
  0x13   :  { %s232_s28 = scalar_lea.hbm %s356_s1, 2176 }
  0x14   :  { %p233_p8 = scmp.ne.s32.totalorder %s356_s1, %s232_s28  ;;  %p236_p9 = scmp.lt.u32.totalorder %s232_s28, %s356_s1 }
  0x16   :  { %p238_p10 = pnand %p236_p9, %p233_p8 }
  0x18   :  { %241 = shalt.err (!%p238_p10)
}
  0x19   :  { %s242_s6 = scalar_lea.vmem %s309_s15, 2176  ;;  %p247_p12 = scmp.lt.s32.totalorder %s309_s15, %s309_s15 }
  0x1a   :  { %p243_p11 = scmp.ne.s32.totalorder %s309_s15, %s242_s6  ;;  %p248_p13 = scmp.lt.s32.totalorder %s242_s6, %s242_s6 }
  0x1c   :  { %p249_p0 = por %p248_p13, %p247_p12 }
  0x1e   :  { %p250_p1 = pnand %p249_p0, %p243_p11 }
  0x20   :  { %253 = shalt.err (!%p250_p1)
}
  0x21   :  { %s284_s0 = smov 128   ;;  %s285_s7 = smov 8  }
  0x22   :  { %32 = dma.hbm_to_vmem [thread:$0]  %s356_s1, 2176, %s309_s15, [#allocation7], %s284_s0, %s284_s0, %s285_s7  }
  0x23   :  { %276 = dma.done.wait [#allocation4], 256  }
  0x24   :  { %277 = vsyncadd [#allocation4], 4294967040 }
  0x25   :  { %278 = dma.done.wait [#allocation7], 2176  }
  0x26   :  { %279 = vsyncadd [#allocation7], 4294965120  ;;  %v286_v0 = vmov 0.0|0.0   ;;  %v49_v1 = vld [vmem:[#allocation6] sm:$0xff]  ;;  %v50_v2 = vld [vmem:[#allocation6 + $0x8] sm:$0xff]  ;;  %vm66_vm0 = vcmask 31744  }
  0x27   :  { %179 = vmatprep.subr.bf16.mxu0 %v286_v0  ;;  %v51_v3 = vld [vmem:[#allocation6 + $0x10] sm:$0xff]  ;;  %v180_v4 = vpack.c.bf16 %v50_v2, %v49_v1  ;;  %v52_v5 = vld [vmem:[#allocation6 + $0x18] sm:$0xff]  ;;  %v53_v7 = vld [vmem:[#allocation6 + $0x20] sm:$0xff]  ;;  %v287_v26 = vmov 0.0   ;;  %vm70_vm1 = vcmask 1043456   ;;  %s288_s11 = smov [#allocation8]  }
  0x28   :  { %v183_v6 = vpack.c.bf16 %v52_v5, %v51_v3  ;;  %v54_v8 = vld [vmem:[#allocation6 + $0x28] sm:$0xff]  ;;  %v48_v9 = vld [vmem:[#allocation3 + $0x8] sm:$0xff]  ;;  %v55_v11 = vld [vmem:[#allocation6 + $0x30] sm:$0xff]  ;;  %s166_s12 = sshll.u32 %s288_s11, 4  ;;  %s167_s12 = int_to_ptr.vmem [resolvable:$true] %s166_s12 }
  0x29   :  { %181 = vmatpush1.bf16.msra.mxu0 %v180_v4  ;;  %177 = vmatprep.mubr.msk.f32.mxu0 %vm66_vm0, %v48_v9  ;;  %v186_v10 = vpack.c.bf16 %v54_v8, %v53_v7  ;;  %v56_v12 = vld [vmem:[#allocation6 + $0x38] sm:$0xff]  ;;  %v57_v14 = vld [vmem:[#allocation6 + $0x40] sm:$0xff]  ;;  %v58_v15 = vld [vmem:[#allocation6 + $0x48] sm:$0xff]  ;;  %s254_s13 = scalar_lea.vmem %s167_s12, 128  ;;  %p259_p3 = scmp.lt.s32.totalorder %s167_s12, %s167_s12 }
  0x2a   :  { %182 = vmatprep.subr.bf16.mxu0 %v286_v0  ;;  %v189_v13 = vpack.c.bf16 %v56_v12, %v55_v11  ;;  %v192_v16 = vpack.c.bf16 %v58_v15, %v57_v14  ;;  %v59_v17 = vld [vmem:[#allocation6 + $0x50] sm:$0xff]  ;;  %v60_v18 = vld [vmem:[#allocation6 + $0x58] sm:$0xff]  ;;  %v61_v20 = vld [vmem:[#allocation6 + $0x60] sm:$0xff]  ;;  %p255_p2 = scmp.ne.s32.totalorder %s167_s12, %s254_s13  ;;  %p260_p4 = scmp.lt.s32.totalorder %s254_s13, %s254_s13 }
  0x2b   :  { %v195_v19 = vpack.c.bf16 %v60_v18, %v59_v17  ;;  %v62_v21 = vld [vmem:[#allocation6 + $0x68] sm:$0xff]  ;;  %v63_v23 = vld [vmem:[#allocation6 + $0x70] sm:$0xff]  ;;  %v64_v24 = vld [vmem:[#allocation6 + $0x78] sm:$0xff] }
  0x2c   :  { %v198_v22 = vpack.c.bf16 %v62_v21, %v61_v20  ;;  %v201_v25 = vpack.c.bf16 %v64_v24, %v63_v23  ;;  %v65_v27 = vld [vmem:[#allocation6 + $0x80] sm:$0xf]  ;;  %v47_v28 = vld [vmem:[#allocation3] sm:$0xff]  ;;  %p261_p5 = por %p260_p4, %p259_p3 }
  0x2d   :  { %184 = vmatpush1.bf16.msra.mxu0 %v183_v6  ;;  %v178_v29 = vld [vmem:[%s357_s2] ss:$0 sm:$0xff] }
  0x2e   :  { %185 = vmatprep.subr.bf16.mxu0 %v286_v0  ;;  %p262_p6 = pnand %p261_p5, %p255_p2 }
  0x31   :  { %187 = vmatpush1.bf16.msra.mxu0 %v186_v10 }
  0x32   :  { %188 = vmatprep.subr.bf16.mxu0 %v286_v0 }
  0x35   :  { %190 = vmatpush1.bf16.msra.mxu0 %v189_v13 }
  0x36   :  { %191 = vmatprep.subr.bf16.mxu0 %v286_v0 }
  0x39   :  { %193 = vmatpush1.bf16.msra.mxu0 %v192_v16 }
  0x3a   :  { %194 = vmatprep.subr.bf16.mxu0 %v286_v0 }
  0x3d   :  { %196 = vmatpush1.bf16.msra.mxu0 %v195_v19 }
  0x3e   :  { %197 = vmatprep.subr.bf16.mxu0 %v286_v0 }
  0x41   :  { %199 = vmatpush1.bf16.msra.mxu0 %v198_v22 }
  0x42   :  { %200 = vmatprep.subr.bf16.mxu0 %v286_v0 }
  0x45   :  { %202 = vmatpush1.bf16.msra.mxu0 %v201_v25 }
  0x46   :  { %106 = vmatprep.subr.mxu0 %v287_v26 }
  0x49   :  { %176 = vmatpush1.msk.msra.mxu0 %vm70_vm1, %v65_v27 }
  0x4a   :  { %139 = vmatmul.mubr.f32.vlgmr.msra.gmra.mrb[0].mxu0 %v47_v28 }
 0x11d   :  { %v140_v30 = vpop.f32.mrb[0].mxu0 }
 0x11e   :  { %v157_v31 = vadd.f32 %v178_v29, %v140_v30  ;;  %v142_v32 = vpop.f32.mrb[1].mxu0 }
 0x120   :  { %v158_v33 = vmax.f32 %v157_v31, 0.0 }
 0x122   :  { %159 = vst [vmem:[#allocation8] sm:$0xff] %v158_v33 }
 0x123   :  { %265 = shalt.err (!%p262_p6)
}
 0x124   :  { %s266_s16 = scalar_lea.hbm %s358_s3, 128 }
 0x125   :  { %p267_p7 = scmp.ne.s32.totalorder %s358_s3, %s266_s16  ;;  %p270_p8 = scmp.lt.u32.totalorder %s266_s16, %s358_s3 }
 0x127   :  { %p272_p9 = pnand %p270_p8, %p267_p7 }
 0x129   :  { %275 = shalt.err (!%p272_p9)
}
 0x12a   :  { %169 = dma.vmem_to_hbm [thread:$0]  %s167_s12, 128, %s358_s3, [#allocation5]  }
 0x12b   :  { %280 = dma.done.wait [#allocation5], 128  }
 0x12c   :  { %281 = vsyncadd [#allocation5], 4294967168 }
 0x12d   :  { %173 = vsyncpa [#allocation4], 1 }
 0x12e   :  { %174 = vsyncpa [#allocation7], 1 }
 0x12f   :  { %175 = vsyncpa [#allocation5], 1 }

</bundles_post_ra>
